<compile_context>
chip_gen: v7x
topology: tpu7x:2x2x1
jax: 0.10.0
libtpu: 0.0.40
codegen_flags: <defaults>
</compile_context>

<pallas_src>
import math

import jax
import jax.numpy as jnp
from jax.experimental import pallas as pl
from jax.experimental.pallas import tpu as pltpu


_LANE = 128
_FALLBACK_VMEM_BUDGET = 48 * 1024 * 1024  # fits every TPU generation


def _round_up(v, m):
    return ((v + m - 1) // m) * m


def _vmem_budget():
    """Generation-aware VMEM budget (~3/4 of physical VMEM), safe fallback 48 MiB."""
    try:
        info = pltpu.get_tpu_info()
        phys = getattr(info, "vmem_capacity_bytes", None)
        if phys is None:
            phys = getattr(info, "vmem_size_bytes", None)
        if phys:
            return int(phys) * 3 // 4
    except Exception:
        pass
    return _FALLBACK_VMEM_BUDGET


def _pick_tiles(n, f_in, h_pad, o_pad, budget):
    """Pick (tm, tk): row tile over output nodes, contraction tile over nodes.

    Prefer keeping the whole contraction resident (tk = n) with a large row tile; fall
    back to K-tiling (tk < n) so the row tile can stay MXU-sized when the full-width
    operands no longer fit (v7x's 64 MiB VMEM at large N)."""
    f32 = 4
    # Weights are whole-array blocks (double-buffered by the pipeline) but tiny.
    const_bytes = f32 * 2 * (f_in * h_pad + h_pad * o_pad)

    def fits(tm, tk):
        # fused GCN kernel: adj tile, x tile, out tile (double buffered) + acc scratch
        k1 = const_bytes + f32 * (
            2 * tm * tk + 2 * tk * f_in + 2 * tm * o_pad + tm * max(f_in, _LANE)
        )
        # log-softmax aggregate kernel
        k2 = f32 * (2 * tm * tk + 2 * tk * o_pad + 3 * tm * o_pad)
        return max(k1, k2) <= budget

    row_cands = sorted(
        {t for t in (1024, 512, 256, 128, 64, 32, 16, 8) if t < n} | {min(n, 1024)},
        reverse=True,
    )

    tm_tk = None
    # 1) whole contraction resident, largest MXU-friendly row tile.
    for tm in row_cands:
        if (tm >= 256 or tm >= n) and fits(tm, n):
            tm_tk = (tm, n)
            break
    # 2) K-tile the contraction so the row tile stays large (v7x-critical at big N).
    if tm_tk is None:
        for tk in (2048, 1024, 512, 256, 128):
            if tk >= n:
                continue
            for tm in (512, 256, 128, 64, 32, 16, 8):
                if fits(tm, tk):
                    tm_tk = (tm, tk)
                    break
            if tm_tk is not None:
                break
    if tm_tk is None:  # unreachable with any realistic budget
        tm_tk = (8, min(128, n))

    tm, tk = tm_tk
    # Guarantee >=2 row steps so both v7x TensorCores get work.
    if tm >= n and n > 8:
        tm = _round_up((n + 1) // 2, 8)
    return tm, tk


# ---------------------------------------------------------------------------
# Kernels
# ---------------------------------------------------------------------------
def _fused_gcn_kernel(adj_ref, x_ref, w1_ref, w2_ref, s2_ref, acc_ref):
    """S2_tile = relu((adj_tile @ x) @ W1p) @ W2p, contraction over nodes K-tiled."""
    k = pl.program_id(1)

    @pl.when(k == 0)
    def _():
        acc_ref[...] = jnp.zeros_like(acc_ref)

    acc_ref[...] += jnp.dot(
        adj_ref[...], x_ref[...], preferred_element_type=jnp.float32
    )

    @pl.when(k == pl.num_programs(1) - 1)
    def _():
        h = jnp.maximum(
            jnp.dot(acc_ref[...], w1_ref[...], preferred_element_type=jnp.float32),
            0.0,
        )
        s2_ref[...] = jnp.dot(
            h, w2_ref[...], preferred_element_type=jnp.float32
        ).astype(s2_ref.dtype)


def _make_logits_kernel(valid_cols):
    """O_tile = log_softmax(adj_tile @ S2) over the first `valid_cols` lanes."""

    def kernel(adj_ref, s2_ref, o_ref, acc_ref):
        k = pl.program_id(1)

        @pl.when(k == 0)
        def _():
            acc_ref[...] = jnp.zeros_like(acc_ref)

        acc_ref[...] += jnp.dot(
            adj_ref[...], s2_ref[...], preferred_element_type=jnp.float32
        )

        @pl.when(k == pl.num_programs(1) - 1)
        def _():
            acc = acc_ref[...]
            col = jax.lax.broadcasted_iota(jnp.int32, acc.shape, 1)
            valid = col < valid_cols
            logits = jnp.where(valid, acc, jnp.float32(-1e30))
            m = jnp.max(logits, axis=1, keepdims=True)
            p = jnp.where(valid, jnp.exp(logits - m), 0.0)
            lse = m + jnp.log(jnp.sum(p, axis=1, keepdims=True))
            # padded lanes hold junk; the wrapper slices them off
            o_ref[...] = (acc - lse).astype(o_ref.dtype)

    return kernel


# ---------------------------------------------------------------------------
# pallas_call wrappers
# ---------------------------------------------------------------------------
def _fused_layer(adj, x, w1_p, w2_p, tm, tk, budget):
    n_rows, n_c = adj.shape
    f_in = x.shape[1]
    h_pad = w1_p.shape[1]
    o_pad = w2_p.shape[1]
    grid = (pl.cdiv(n_rows, tm), n_c // tk)
    cost = pl.CostEstimate(
        flops=2 * n_rows * n_c * f_in
        + 2 * n_rows * f_in * h_pad
        + 2 * n_rows * h_pad * o_pad,
        transcendentals=0,
        bytes_accessed=4
        * (n_rows * n_c + n_c * f_in + f_in * h_pad + h_pad * o_pad + n_rows * o_pad),
    )
    return pl.pallas_call(
        _fused_gcn_kernel,
        out_shape=jax.ShapeDtypeStruct((n_rows, o_pad), jnp.float32),
        grid=grid,
        in_specs=[
            pl.BlockSpec((tm, tk), lambda i, k: (i, k)),
            pl.BlockSpec((tk, f_in), lambda i, k: (k, 0)),
            pl.BlockSpec((f_in, h_pad), lambda i, k: (0, 0)),
            pl.BlockSpec((h_pad, o_pad), lambda i, k: (0, 0)),
        ],
        out_specs=pl.BlockSpec((tm, o_pad), lambda i, k: (i, 0)),
        scratch_shapes=[pltpu.VMEM((tm, f_in), jnp.float32)],
        compiler_params=pltpu.CompilerParams(
            dimension_semantics=("parallel", "arbitrary"),
            vmem_limit_bytes=budget,
        ),
        cost_estimate=cost,
    )(adj, x, w1_p, w2_p)


def _logits_layer(adj, s2, valid_cols, tm, tk, budget):
    n_rows, n_c = adj.shape
    o_pad = s2.shape[1]
    grid = (pl.cdiv(n_rows, tm), n_c // tk)
    cost = pl.CostEstimate(
        flops=2 * n_rows * n_c * o_pad,
        transcendentals=2 * n_rows * o_pad,
        bytes_accessed=4 * (n_rows * n_c + n_c * o_pad + n_rows * o_pad),
    )
    return pl.pallas_call(
        _make_logits_kernel(valid_cols),
        out_shape=jax.ShapeDtypeStruct((n_rows, o_pad), jnp.float32),
        grid=grid,
        in_specs=[
            pl.BlockSpec((tm, tk), lambda i, k: (i, k)),
            pl.BlockSpec((tk, o_pad), lambda i, k: (k, 0)),
        ],
        out_specs=pl.BlockSpec((tm, o_pad), lambda i, k: (i, 0)),
        scratch_shapes=[pltpu.VMEM((tm, o_pad), jnp.float32)],
        compiler_params=pltpu.CompilerParams(
            dimension_semantics=("parallel", "arbitrary"),
            vmem_limit_bytes=budget,
        ),
        cost_estimate=cost,
    )(adj, s2)


# ---------------------------------------------------------------------------
# Exact2 forward
# ---------------------------------------------------------------------------
def exact2_forward(x, adj, w1, w2, dropout=0.0):
    """log_softmax(adj @ relu(adj @ x @ W1) @ W2, axis=1) — eval-mode forward."""
    n, in_dim = x.shape
    hid = w1.shape[1]
    out_dim = w2.shape[1]
    h_pad = _round_up(hid, _LANE)
    o_pad = _round_up(out_dim, _LANE)

    budget = _vmem_budget()
    tm, tk = _pick_tiles(n, in_dim, h_pad, o_pad, budget)

    x_f = x.astype(jnp.float32)
    adj_f = adj.astype(jnp.float32)

    # Zero-pad the weight feature dims to multiples of 128 -> lane-dense kernel outputs.
    w1_p = jnp.zeros((in_dim, h_pad), jnp.float32).at[:, :hid].set(w1.astype(jnp.float32))
    w2_p = jnp.zeros((h_pad, o_pad), jnp.float32).at[:hid, :out_dim].set(w2.astype(jnp.float32))

    # K-tiling over the contraction (node) dim needs it to divide tk exactly; pad the graph
    # with isolated zero nodes (they contribute exactly 0 and are sliced off at the end).
    if tk < n and n % tk != 0:
        n_c = _round_up(n, tk)
        adj_f = jnp.zeros((n_c, n_c), jnp.float32).at[:n, :n].set(adj_f)
        x_f = jnp.zeros((n_c, in_dim), jnp.float32).at[:n, :].set(x_f)

    # TODO(synk): F.dropout(training=True), the rdp/rdp2 no_grad bookkeeping, and the
    # register_hook gradient capture in GCN2 are training-only side effects; the
    # eval-mode forward (dropout = identity) skips them.
    s2 = _fused_layer(adj_f, x_f, w1_p, w2_p, tm, tk, budget)    # relu((adj@x)@W1)@W2
    out = _logits_layer(adj_f, s2, out_dim, tm, tk, budget)      # log_softmax(adj@s2)
    return out[:n, :out_dim]


def init_layer(key, in_features, out_features):
    """Mirror GraphConvolution2.reset_parameters(): U(-stdv, stdv), stdv = 1/sqrt(out)."""
    stdv = 1.0 / math.sqrt(out_features)
    k_w, k_b = jax.random.split(key)
    weight = jax.random.uniform(
        k_w, (in_features, out_features), jnp.float32, minval=-stdv, maxval=stdv
    )
    bias = jax.random.uniform(
        k_b, (out_features,), jnp.float32, minval=-stdv, maxval=stdv
    )  # created for parity; unused in forward (matches the PyTorch module)
    return weight, bias


def _reference(x, adj, w1, w2):
    h1 = jax.nn.relu(adj @ (x @ w1))
    out = adj @ (h1 @ w2)
    return jax.nn.log_softmax(out, axis=1)


if __name__ == "__main__":
    key = jax.random.PRNGKey(0)
    k_x, k_adj, k_l1, k_l2 = jax.random.split(key, 4)

    N, IN_DIM, HID_DIM, OUT_DIM = 16, 32, 64, 8
    DROPOUT = 0.5  # identity in eval-mode forward

    x = jax.random.normal(k_x, (N, IN_DIM), jnp.float32)
    adj = jax.random.uniform(k_adj, (N, N), jnp.float32)
    adj = adj / jnp.sum(adj, axis=1, keepdims=True)  # row-normalized adjacency

    w1, b1 = init_layer(k_l1, IN_DIM, HID_DIM)
    w2, b2 = init_layer(k_l2, HID_DIM, OUT_DIM)

    out = exact2_forward(x, adj, w1, w2, dropout=DROPOUT)
    out = jax.block_until_ready(out)

    ref = _reference(x, adj, w1, w2)
    assert out.shape == (N, OUT_DIM)
    assert jnp.allclose(out, ref, atol=2e-4, rtol=2e-4), float(jnp.max(jnp.abs(out - ref)))

    print("KERNEL_OK")
</pallas_src>

<mosaic_0001>
module attributes {stable_mosaic.version = 11 : i64} {
  func.func @_fused_gcn_kernel(%arg0: i32, %arg1: i32, %arg2: memref<8x16xf32, #tpu.memory_space<vmem>>, %arg3: memref<16x32xf32, #tpu.memory_space<vmem>>, %arg4: memref<32x128xf32, #tpu.memory_space<vmem>>, %arg5: memref<128x128xf32, #tpu.memory_space<vmem>>, %arg6: memref<8x128xf32, #tpu.memory_space<vmem>>, %arg7: memref<8x32xf32, #tpu.memory_space<vmem>>) attributes {dimension_semantics = [#tpu.dimension_semantics<parallel>, #tpu.dimension_semantics<arbitrary>], iteration_bounds = array<i64: 2, 1>, scalar_prefetch = 0 : i64, scratch_operands = 1 : i64, tpu.core_type = #tpu.core_type<tc>, window_params = [{transform_indices = @transform_0, window_bounds = array<i64: 8, 16>}, {transform_indices = @transform_1, window_bounds = array<i64: 16, 32>}, {pipeline_mode = #tpu.pipeline_mode<synchronous>, transform_indices = @transform_2, window_bounds = array<i64: 32, 128>}, {pipeline_mode = #tpu.pipeline_mode<synchronous>, transform_indices = @transform_3, window_bounds = array<i64: 128, 128>}, {transform_indices = @transform_4, window_bounds = array<i64: 8, 128>}]} {
    %c0_i32 = arith.constant 0 : i32
    %0 = arith.cmpi eq, %arg1, %c0_i32 : i32
    %1 = arith.extui %0 : i1 to i32
    %c0_i32_0 = arith.constant 0 : i32
    %2 = arith.cmpi ne, %1, %c0_i32_0 : i32
    scf.if %2 {
      %cst_10 = arith.constant 0.000000e+00 : f32
      %12 = vector.broadcast %cst_10 : f32 to vector<8x32xf32>
      %c0_11 = arith.constant 0 : index
      %c0_12 = arith.constant 0 : index
      %13 = vector.load %arg7[%c0_11, %c0_12] : memref<8x32xf32, #tpu.memory_space<vmem>>, vector<8x32xf32>
      tpu.vector_store %arg7[%c0_11, %c0_12], %12 {strides = array<i32>} : memref<8x32xf32, #tpu.memory_space<vmem>>, vector<8x32xf32>,
    } else {
    }
    %c0 = arith.constant 0 : index
    %c0_1 = arith.constant 0 : index
    %3 = vector.load %arg7[%c0, %c0_1] : memref<8x32xf32, #tpu.memory_space<vmem>>, vector<8x32xf32>
    %c0_2 = arith.constant 0 : index
    %c0_3 = arith.constant 0 : index
    %4 = vector.load %arg2[%c0_2, %c0_3] : memref<8x16xf32, #tpu.memory_space<vmem>>, vector<8x16xf32>
    %c0_4 = arith.constant 0 : index
    %c0_5 = arith.constant 0 : index
    %5 = vector.load %arg3[%c0_4, %c0_5] : memref<16x32xf32, #tpu.memory_space<vmem>>, vector<16x32xf32>
    %cst = arith.constant dense<0.000000e+00> : vector<8x32xf32>
    %6 = tpu.matmul %4, %5, %cst {dimension_numbers = #tpu.dot_dimension_numbers<[1], [0], [0], [1], [0, 0, 1, 1], [], []>} : vector<8x16xf32>, vector<16x32xf32>, vector<8x32xf32> -> vector<8x32xf32>
    %7 = arith.addf %3, %6 : vector<8x32xf32>
    %c0_6 = arith.constant 0 : index
    %c0_7 = arith.constant 0 : index
    %8 = vector.load %arg7[%c0_6, %c0_7] : memref<8x32xf32, #tpu.memory_space<vmem>>, vector<8x32xf32>
    tpu.vector_store %arg7[%c0_6, %c0_7], %7 {strides = array<i32>} : memref<8x32xf32, #tpu.memory_space<vmem>>, vector<8x32xf32>,
    %c0_i32_8 = arith.constant 0 : i32
    %9 = arith.cmpi eq, %arg1, %c0_i32_8 : i32
    %10 = arith.extui %9 : i1 to i32
    %c0_i32_9 = arith.constant 0 : i32
    %11 = arith.cmpi ne, %10, %c0_i32_9 : i32
    scf.if %11 {
      %c0_10 = arith.constant 0 : index
      %c0_11 = arith.constant 0 : index
      %12 = vector.load %arg7[%c0_10, %c0_11] : memref<8x32xf32, #tpu.memory_space<vmem>>, vector<8x32xf32>
      %c0_12 = arith.constant 0 : index
      %c0_13 = arith.constant 0 : index
      %13 = vector.load %arg4[%c0_12, %c0_13] : memref<32x128xf32, #tpu.memory_space<vmem>>, vector<32x128xf32>
      %cst_14 = arith.constant dense<0.000000e+00> : vector<8x128xf32>
      %14 = tpu.matmul %12, %13, %cst_14 {dimension_numbers = #tpu.dot_dimension_numbers<[1], [0], [0], [1], [0, 0, 1, 1], [], []>} : vector<8x32xf32>, vector<32x128xf32>, vector<8x128xf32> -> vector<8x128xf32>
      %cst_15 = arith.constant 0.000000e+00 : f32
      %15 = vector.broadcast %cst_15 : f32 to vector<8x128xf32>
      %16 = arith.maximumf %14, %15 : vector<8x128xf32>
      %c0_16 = arith.constant 0 : index
      %c0_17 = arith.constant 0 : index
      %17 = vector.load %arg5[%c0_16, %c0_17] : memref<128x128xf32, #tpu.memory_space<vmem>>, vector<128x128xf32>
      %cst_18 = arith.constant dense<0.000000e+00> : vector<8x128xf32>
      %18 = tpu.matmul %16, %17, %cst_18 {dimension_numbers = #tpu.dot_dimension_numbers<[1], [0], [0], [1], [0, 0, 1, 1], [], []>} : vector<8x128xf32>, vector<128x128xf32>, vector<8x128xf32> -> vector<8x128xf32>
      %c0_19 = arith.constant 0 : index
      %c0_20 = arith.constant 0 : index
      %19 = vector.load %arg6[%c0_19, %c0_20] : memref<8x128xf32, #tpu.memory_space<vmem>>, vector<8x128xf32>
      tpu.vector_store %arg6[%c0_19, %c0_20], %18 {strides = array<i32>} : memref<8x128xf32, #tpu.memory_space<vmem>>, vector<8x128xf32>,
    } else {
    }
    return
  }
  func.func @transform_0(%arg0: i32, %arg1: i32) -> (i32, i32) {
    %c0_i32 = arith.constant 0 : i32
    return %arg0, %arg1 : i32, i32
  }
  func.func @transform_1(%arg0: i32, %arg1: i32) -> (i32, i32) {
    %c0_i32 = arith.constant 0 : i32
    %c0_i32_0 = arith.constant 0 : i32
    return %arg1, %c0_i32 : i32, i32
  }
  func.func @transform_2(%arg0: i32, %arg1: i32) -> (i32, i32) {
    %c0_i32 = arith.constant 0 : i32
    %c0_i32_0 = arith.constant 0 : i32
    %c0_i32_1 = arith.constant 0 : i32
    return %c0_i32, %c0_i32_0 : i32, i32
  }
  func.func @transform_3(%arg0: i32, %arg1: i32) -> (i32, i32) {
    %c0_i32 = arith.constant 0 : i32
    %c0_i32_0 = arith.constant 0 : i32
    %c0_i32_1 = arith.constant 0 : i32
    return %c0_i32, %c0_i32_0 : i32, i32
  }
  func.func @transform_4(%arg0: i32, %arg1: i32) -> (i32, i32) {
    %c0_i32 = arith.constant 0 : i32
    %c0_i32_0 = arith.constant 0 : i32
    return %arg0, %c0_i32 : i32, i32
  }
}

</mosaic_0001>

<bundles_post_ra>
// kernel: tpu_custom_call.1
= control target key start
LH: loop header
LB: loop body
LE: loop exit
PB: predicated region body
PF: predicated region fallthrough
CT: control target
= control target key end

     0   :  { %9 = vsyncpa [#allocation4], 0  ;;  %s1423_s0 = inlined_call_operand.hbm [shape: f32[16,16], index: 0, kind: input, shape index: {}]   ;;  %s1424_s1 = inlined_call_operand.hbm [shape: f32[16,32], index: 1, kind: input, shape index: {}]   ;;  %s1425_s2 = inlined_call_operand.hbm [shape: f32[32,128], index: 2, kind: input, shape index: {}]   ;;  %s1426_s3 = inlined_call_operand.hbm [shape: f32[128,128], index: 3, kind: input, shape index: {}]   ;;  %s1427_s4 = inlined_call_operand.hbm [shape: f32[16,128], index: 4, kind: output, shape index: {}]  }
   0x1   :  { %11 = vsyncpa [#allocation4 + $0x1], 0 }
   0x2   :  { %12 = vsyncpa [#allocation7], 0 }
   0x3   :  { %13 = vsyncpa [#allocation10], 0 }
   0x4   :  { %14 = vsyncpa [#allocation5], 0 }
   0x5   :  { %16 = vsyncpa [#allocation5 + $0x1], 0  ;;  %s1132_s15 = smov 0   ;;  %s1134_s16 = smov 0  }
   0x6   :  { %s1136_s17 = smov 0   ;;  %s1138_s18 = smov 0  }
   0x7   :  { %s1140_s19 = smov 0   ;;  %s1142_s20 = smov 0  }
   0x8 LB: > { %s661_s21 = sadd.s32 4294967295, %s1095_s20   ;;  %s662_s22 = sadd.s32 4294967294, %s1095_s20   ;;  %s1095_s20 = sphi %s1142_s20, %s22_s20   ;;  %s1091_s19 = sphi %s1140_s19, %s1454_s19   ;;  %s1087_s18 = sphi %s1138_s18, %s1453_s18   ;;  %s1083_s17 = sphi %s1136_s17, %s1452_s17   ;;  %s1079_s16 = sphi %s1134_s16, %s1451_s16   ;;  %s1075_s15 = sphi %s1132_s15, %s1450_s15  }
   0x9   : > { %p56_p0 = scmp.ne.s32.totalorder %s1079_s16, %s1075_s15  ;;  %p1166_p1 = scmp.eq.s32.totalorder %s661_s21, 0 }
   0xa   : > { %p1170_p2 = scmp.eq.s32.totalorder %s661_s21, 1  ;;  %p154_p3 = scmp.eq.s32.totalorder %s662_s22, 1 }
   0xb   : > { %s1433_s23 = scalar_select %p1166_p1, 1, 0 }
   0xc   : > { %s1434_s24 = scalar_select %p1170_p2, 1, 0 }
   0xd   : > { %p1176_p4 = por %p1166_p1, %p56_p0  ;;  %p663_p5 = scmp.ge.s32.totalorder %s1095_s20, 1 }
   0xe   : > { %p1181_p6 = por %p154_p3, %p56_p0  ;;  %p161_p7 = scmp.lt.s32.totalorder %s1095_s20, 3 }
   0xf   : > { %s1435_s25 = scalar_select %p1176_p4, 1, 0 }
  0x10   : > { %s1436_s26 = scalar_select %p1181_p6, 1, 0 }
  0x11   : > { %p1186_p8 = pnand %p663_p5, %p161_p7  ;;  %s1097_s28 = smov [#allocation6]  }
  0x12   : > { %1437 = sst [smem:[#allocation16_spill]] %s1436_s26  ;;  %s176_s29 = sshll.u32 %s1097_s28, 4  ;;  %s1190_s29 = int_to_ptr.vmem [resolvable:$true] %s176_s29 }
  0x13   : > { %s1438_s27 = scalar_select %p1186_p8, 1, 0 }
  0x14   : > { %p809_p9 = pneg %p1186_p8  ;;  %s1098_s5 = smov [#allocation8]  }
  0x15   : > { %s189_s6 = sshll.u32 %s1098_s5, 4  ;;  %s1099_s7 = smov [#allocation9]   ;;  %s1201_s6 = int_to_ptr.vmem [resolvable:$true] %s189_s6 }
  0x16   : > { %p1197_p11 = pnand %p809_p9, %p1166_p1  ;;  %s1203_s8 = sshll.u32 %s1099_s7, 4  ;;  %s203_s8 = int_to_ptr.vmem [resolvable:$true] %s1203_s8 }
  0x17   : > { %s891_s11 = scalar_lea.hbm %s1424_s1, 256 }
  0x18   : > { %p892_p12 = scmp.ne.s32.totalorder %s1424_s1, %s891_s11  ;;  %p1213_p13 = pneg %p1197_p11 }
  0x19   : > { %p898_p5 = scmp.lt.u32.totalorder %s891_s11, %s1424_s1 }
  0x1a   : > { %p894_p0 = pnand %p1213_p13, %p892_p12 }
  0x1c   : > { %p895_p3 = pneg %p894_p0 }
  0x1e   : > { %p900_p7 = pnand %p898_p5, %p895_p3 }
  0x20   : > { %903 = shalt.err (!%p900_p7)
}
  0x21   : > { %s904_s28 = scalar_lea.vmem %s1190_s29, 256  ;;  %p912_p1 = scmp.lt.s32.totalorder %s1190_s29, %s1190_s29 }
  0x22   : > { %p905_p9 = scmp.ne.s32.totalorder %s1190_s29, %s904_s28  ;;  %p913_p4 = scmp.lt.s32.totalorder %s904_s28, %s904_s28 }
  0x24   : > { %p907_p10 = pnand %p905_p9, %p1213_p13  ;;  %p914_p12 = por %p913_p4, %p912_p1 }
  0x26   : > { %p908_p6 = pneg %p907_p10 }
  0x28   : > { %p915_p0 = pnand %p914_p12, %p908_p6 }
  0x2a   : > { %918 = shalt.err (!%p915_p0)
}
  0x2b   : > { %s1100_s5 = smov 128   ;;  %s1101_s7 = smov 8  }
  0x2c   : > { %812 = dma.hbm_to_vmem [thread:$0]  (!%p1197_p11), %s1424_s1, 256, %s1190_s29, [#allocation7], %s1100_s5, %s1100_s5, %s1101_s7  }
  0x2d   : > { %s919_s13 = scalar_lea.hbm %s1425_s2, 512 }
  0x2e   : > { %p920_p1 = scmp.ne.s32.totalorder %s1425_s2, %s919_s13  ;;  %p926_p10 = scmp.lt.u32.totalorder %s919_s13, %s1425_s2 }
  0x30   : > { %p922_p4 = pnand %p920_p1, %p1213_p13 }
  0x32   : > { %p923_p6 = pneg %p922_p4 }
  0x34   : > { %p928_p3 = pnand %p926_p10, %p923_p6 }
  0x36   : > { %931 = shalt.err (!%p928_p3)
}
  0x37   : > { %s932_s29 = scalar_lea.vmem %s1201_s6, 512  ;;  %p940_p12 = scmp.lt.s32.totalorder %s1201_s6, %s1201_s6 }
  0x38   : > { %p933_p5 = scmp.ne.s32.totalorder %s1201_s6, %s932_s29  ;;  %p941_p0 = scmp.lt.s32.totalorder %s932_s29, %s932_s29 }
  0x3a   : > { %p935_p7 = pnand %p933_p5, %p1213_p13  ;;  %p942_p1 = por %p941_p0, %p940_p12 }
  0x3c   : > { %p936_p9 = pneg %p935_p7 }
  0x3e   : > { %p943_p4 = pnand %p942_p1, %p936_p9 }
  0x40   : > { %946 = shalt.err (!%p943_p4)
}
  0x41   : > { %815 = dma.hbm_to_vmem [thread:$0]  (!%p1197_p11), %s1425_s2, 512, %s1201_s6, [#allocation7], %s1100_s5, %s1100_s5, %s1101_s7  }
  0x42   : > { %s947_s12 = scalar_lea.hbm %s1426_s3, 2048 }
  0x43   : > { %p948_p6 = scmp.ne.s32.totalorder %s1426_s3, %s947_s12  ;;  %p954_p5 = scmp.lt.u32.totalorder %s947_s12, %s1426_s3 }
  0x45   : > { %p950_p10 = pnand %p948_p6, %p1213_p13 }
  0x47   : > { %p951_p3 = pneg %p950_p10 }
  0x49   : > { %p956_p7 = pnand %p954_p5, %p951_p3 }
  0x4b   : > { %959 = shalt.err (!%p956_p7)
}
  0x4c   : > { %s960_s29 = scalar_lea.vmem %s203_s8, 2048  ;;  %p968_p1 = scmp.lt.s32.totalorder %s203_s8, %s203_s8 }
  0x4d   : > { %p961_p9 = scmp.ne.s32.totalorder %s203_s8, %s960_s29  ;;  %p969_p4 = scmp.lt.s32.totalorder %s960_s29, %s960_s29 }
  0x4f   : > { %p963_p12 = pnand %p961_p9, %p1213_p13  ;;  %p970_p8 = por %p969_p4, %p968_p1 }
  0x51   : > { %p964_p0 = pneg %p963_p12 }
  0x53   : > { %p971_p2 = pnand %p970_p8, %p964_p0 }
  0x55   : > { %974 = shalt.err (!%p971_p2)
}
  0x56   : > { %818 = dma.hbm_to_vmem [thread:$0]  (!%p1197_p11), %s1426_s3, 2048, %s203_s8, [#allocation10], %s1100_s5, %s1100_s5, %s1101_s7  }
  0x57   : > { %s43_s14 = sadd.s32 1, %s1083_s17  ;;  %s34_s30 = sadd.s32 1, %s1091_s19 }
  0x58   : > { %p50_p2 = scmp.ne.s32.totalorder %s1083_s17, %s1079_s16  ;;  %p36_p8 = scmp.ge.s32.totalorder %s34_s30, 2 }
  0x59   : > { %p51_p13 = scmp.eq.s32.totalorder %s1095_s20, 0  ;;  %p1441_p6 = scmp.ne.s32.totalorder %s1434_s24, 0 }
  0x5a   : > { %p830_p3 = scmp.lt.s32.totalorder %s1095_s20, 2  ;;  %s1456_s30 = smov (%p36_p8, %s34_s30), 0 }
  0x5b   : > { %p1292_p10 = por %p1441_p6, %p50_p2  ;;  %p52_p5 = por %p51_p13, %p50_p2 }
  0x5c   : > { %s216_s10 = sand.u32 1, %s1083_s17   ;;  %s38_s11 = ssub.s32 %s1091_s19, %s1456_s30 }
  0x5d   : > { %p41_p7 = scmp.eq.s32.totalorder %s38_s11, 0  ;;  %s668_s8 = sshll.u32 %s216_s10, 3 }
  0x5e   : > { %s669_s5 = sshll.u32 %s1091_s19, 7  ;;  %s220_s21 = scalar_lea.vmem [#allocation3], %s668_s8 }
  0x5f   : > { %s1304_s7 = scalar_select %p41_p7, %s1083_s17, %s43_s14  }
  0x60   : > { %s1309_s24 = scalar_lea.hbm %s1423_s0, %s669_s5  ;;  %s228_s22 = sshll.u32 %s220_s21, 4  ;;  %s1311_s22 = int_to_ptr.vmem [resolvable:$true] %s228_s22 }
  0x61   : > { %p1315_p11 = pnand %p830_p3, %p52_p5  ;;  %s217_s29 = scalar_lea.sflag [#allocation4], %s216_s10 }
  0x62   : > { %s975_s6 = scalar_lea.hbm %s1309_s24, 128  ;;  %s980_s11 = scalar_lea.hbm %s1423_s0, 256 }
  0x63   : > { %p976_p9 = scmp.ne.s32.totalorder %s1309_s24, %s975_s6  ;;  %p977_p12 = pneg %p1315_p11 }
  0x64   : > { %p981_p4 = scmp.lt.u32.totalorder %s1309_s24, %s1423_s0  ;;  %p982_p2 = scmp.lt.u32.totalorder %s980_s11, %s975_s6 }
  0x65   : > { %p978_p0 = pnand %p977_p12, %p976_p9  ;;  %p984_p13 = scmp.lt.u32.totalorder %s975_s6, %s1309_s24 }
  0x66   : > { %p983_p8 = por %p982_p2, %p981_p4 }
  0x67   : > { %p979_p1 = pneg %p978_p0 }
  0x68   : > { %p985_p6 = por %p984_p13, %p983_p8 }
  0x6a   : > { %p986_p3 = pnand %p985_p6, %p979_p1 }
  0x6c   : > { %989 = shalt.err (!%p986_p3)
}
  0x6d   : > { %s990_s10 = scalar_lea.vmem %s1311_s22, 128  ;;  %s1102_s12 = smov [#allocation3]  }
  0x6e   : > { %p991_p5 = scmp.ne.s32.totalorder %s1311_s22, %s990_s10  ;;  %s995_s13 = sshll.u32 %s1102_s12, 4  ;;  %s996_s13 = int_to_ptr.vmem [resolvable:$false] %s995_s13 }
  0x6f   : > { %s997_s21 = scalar_lea.vmem %s996_s13, 256  ;;  %p998_p0 = scmp.lt.s32.totalorder %s1311_s22, %s996_s13 }
  0x70   : > { %p993_p7 = pnand %p991_p5, %p977_p12  ;;  %p999_p4 = scmp.lt.s32.totalorder %s997_s21, %s990_s10 }
  0x72   : > { %p994_p9 = pneg %p993_p7  ;;  %p1000_p2 = por %p999_p4, %p998_p0 }
  0x74   : > { %p1001_p8 = pnand %p1000_p2, %p994_p9 }
  0x76   : > { %1004 = shalt.err (!%p1001_p8)
}
  0x77   : > { %822 = dma.hbm_to_vmem [thread:$0]  (!%p1315_p11), %s1309_s24, 128, %s1311_s22, %s217_s29  }
  0x78   : > { %p1444_p1 = scmp.ne.s32.totalorder %s1438_s27, 0 }
  0x79   : > { %s1347_s6 = sand.u32 (!%p1444_p1), 1, %s1079_s16   ;;  %p1445_p12 = scmp.ne.s32.totalorder (!%p1444_p1), %s1435_s25, 0 }
  0x7a   : > { %237 = sbr.rel (%p1444_p1) target bundleno = 804 (0x324), region = 36  ;;  %s671_s26 = sshll.u32 (!%p1444_p1), %s1347_s6, 3 }
  0x7b   : > { %s240_s14 = scalar_lea.sflag (!%p1444_p1), [#allocation4], %s1347_s6  ;;  %s243_s11 = scalar_lea.vmem (!%p1444_p1), [#allocation3], %s671_s26 }
  0x81   : > { %1058 = dma.done.wait (%p1445_p12), %s240_s14, 128  }
  0x82   : > { %1060 = vsyncadd (%p1445_p12), %s240_s14, 4294967168  ;;  %p1446_p11 = scmp.ne.s32.totalorder %s1433_s23, 0 }
  0x84   : > { %1062 = dma.done.wait (%p1446_p11), [#allocation7], 768  }
  0x85   : > { %1064 = vsyncadd (%p1446_p11), [#allocation7], 4294966528 }
  0x86   : > { %1066 = dma.done.wait (%p1446_p11), [#allocation10], 2048  }
  0x87   : > { %1068 = vsyncadd (%p1446_p11), [#allocation10], 4294965248  ;;  %v1103_v0 = vmov 0.0|0.0   ;;  %vm1104_vm0 = vmmov 0   ;;  %v1105_v1 = vmov 0.0   ;;  %vm285_vm1 = vcmask 261120  }
  0x88   : > { %760 = vmatprep.subr.bf16.mxu1 %v1103_v0  ;;  %711 = vmatprep.mubr.msk.f32.mxu1 %vm1104_vm0, %v1105_v1  ;;  %286 = vst.msk [vmem:[#allocation2] sm:$0xff] %vm285_vm1, %v1105_v1  ;;  %v289_v2 = vld [vmem:[#allocation6] sm:$0xff]  ;;  %v290_v3 = vld [vmem:[#allocation6 + $0x8] sm:$0xff]  ;;  %v288_v5 = vld [vmem:[%s243_s11] sm:$0xff]  ;;  %vm291_vm2 = vcmask 130048   ;;  %s279_s23 = scalar_lea.vmem [#allocation11], %s671_s26 }
  0x89   : > { %769 = vmatprep.subr.bf16.mxu0 %v1103_v0  ;;  %757 = vmatprep.mubr.msk.f32.mxu0 %vm1104_vm0, %v1105_v1  ;;  %v761_v4 = vpack.c.bf16 %v290_v3, %v289_v2  ;;  %v372_v6 = vld [vmem:[#allocation8] sm:$0xff]  ;;  %v373_v7 = vld [vmem:[#allocation8 + $0x8] sm:$0xff]  ;;  %v374_v9 = vld [vmem:[#allocation8 + $0x10] sm:$0xff]  ;;  %s551_s25 = sshll.u32 %s279_s23, 4  ;;  %s679_s27 = sshll.u32 %s1087_s18, 7  ;;  %s1371_s25 = int_to_ptr.vmem [resolvable:$true] %s551_s25 }
  0x8a   : > { %v764_v8 = vpack.c.bf16 %v373_v7, %v372_v6  ;;  %v375_v10 = vld [vmem:[#allocation8 + $0x18] sm:$0xff]  ;;  %v450_v12 = vld [vmem:[#allocation9] sm:$0xff]  ;;  %v451_v13 = vld [vmem:[#allocation9 + $0x8] sm:$0xff]  ;;  %s1376_s28 = scalar_lea.hbm %s1427_s4, %s679_s27  ;;  %s538_s29 = scalar_lea.sflag [#allocation5], %s1347_s6 }
  0x8b   : > { %762 = vmatpush3.bf16.msra.mxu1 %v761_v4  ;;  %v767_v11 = vpack.c.bf16 %v375_v10, %v374_v9  ;;  %v452_v14 = vld [vmem:[#allocation9 + $0x10] sm:$0xff]  ;;  %v770_v15 = vpack.c.bf16 %v451_v13, %v450_v12  ;;  %v453_v16 = vld [vmem:[#allocation9 + $0x18] sm:$0xff]  ;;  %v454_v18 = vld [vmem:[#allocation9 + $0x20] sm:$0xff]  ;;  %s1005_s8 = scalar_lea.vmem %s1371_s25, 128  ;;  %s1106_s18 = smov [#allocation11]  }
  0x8c   : > { %763 = vmatprep.subr.bf16.mxu1 %v1103_v0  ;;  %v773_v17 = vpack.c.bf16 %v453_v16, %v452_v14  ;;  %v455_v19 = vld [vmem:[#allocation9 + $0x28] sm:$0xff]  ;;  %v456_v21 = vld [vmem:[#allocation9 + $0x30] sm:$0xff]  ;;  %v457_v22 = vld [vmem:[#allocation9 + $0x38] sm:$0xff]  ;;  %p1006_p13 = scmp.ne.s32.totalorder %s1371_s25, %s1005_s8  ;;  %s1009_s5 = sshll.u32 %s1106_s18, 4  ;;  %s1010_s5 = int_to_ptr.vmem [resolvable:$false] %s1009_s5 }
  0x8d   : > { %771 = vmatpush3.bf16.msra.mxu0 %v770_v15  ;;  %v776_v20 = vpack.c.bf16 %v455_v19, %v454_v18  ;;  %v779_v23 = vpack.c.bf16 %v457_v22, %v456_v21  ;;  %v458_v24 = vld [vmem:[#allocation9 + $0x40] sm:$0xff]  ;;  %v459_v25 = vld [vmem:[#allocation9 + $0x48] sm:$0xff]  ;;  %v460_v27 = vld [vmem:[#allocation9 + $0x50] sm:$0xff]  ;;  %s1011_s10 = scalar_lea.vmem %s1010_s5, 256  ;;  %p1012_p5 = scmp.lt.s32.totalorder %s1371_s25, %s1010_s5 }
  0x8e   : > { %712 = vmatmul.mubr.msk.f32.vlgmr.msra.gmra.mrb[0].mxu1 %vm291_vm2, %v288_v5  ;;  %772 = vmatprep.subr.bf16.mxu0 %v1103_v0  ;;  %v782_v26 = vpack.c.bf16 %v459_v25, %v458_v24  ;;  %v461_v28 = vld [vmem:[#allocation9 + $0x58] sm:$0xff]  ;;  %v462_v30 = vld [vmem:[#allocation9 + $0x60] sm:$0xff]  ;;  %v463_v31 = vld [vmem:[#allocation9 + $0x68] sm:$0xff]  ;;  %p1007_p6 = pnand %p1006_p13, %p1292_p10  ;;  %p1013_p7 = scmp.lt.s32.totalorder %s1011_s10, %s1005_s8 }
  0x8f   : > { %722 = vmatprep.mubr.msk.f32.mxu1 %vm1104_vm0, %v1105_v1  ;;  %765 = vmatpush3.bf16.msra.mxu1 %v764_v8  ;;  %v785_v29 = vpack.c.bf16 %v461_v28, %v460_v27  ;;  %v788_v32 = vpack.c.bf16 %v463_v31, %v462_v30  ;;  %v287_v33 = vld [vmem:[#allocation2] sm:$0xff]  ;;  %v464_v38 = vld [vmem:[#allocation9 + $0x70] sm:$0xff] }
  0x90   : > { %766 = vmatprep.subr.bf16.mxu1 %v1103_v0  ;;  %v465_v39 = vld [vmem:[#allocation9 + $0x78] sm:$0xff]  ;;  %p1008_p3 = pneg %p1007_p6  ;;  %p1014_p9 = por %p1013_p7, %p1012_p5 }
  0x91   : > { %774 = vmatpush3.bf16.msra.mxu0 %v773_v17  ;;  %v791_v40 = vpack.c.bf16 %v465_v39, %v464_v38 }
  0x92   : > { %775 = vmatprep.subr.bf16.mxu0 %v1103_v0  ;;  %p1015_p0 = pnand %p1014_p9, %p1008_p3 }
  0x93   : > { %768 = vmatpush3.bf16.msra.mxu1 %v767_v11 }
  0x95   : > { %777 = vmatpush3.bf16.msra.mxu0 %v776_v20 }
  0x96   : > { %778 = vmatprep.subr.bf16.mxu0 %v1103_v0 }
  0x99   : > { %780 = vmatpush3.bf16.msra.mxu0 %v779_v23 }
  0x9a   : > { %781 = vmatprep.subr.bf16.mxu0 %v1103_v0 }
  0x9d   : > { %783 = vmatpush3.bf16.msra.mxu0 %v782_v26 }
  0x9e   : > { %784 = vmatprep.subr.bf16.mxu0 %v1103_v0 }
  0xa1   : > { %786 = vmatpush3.bf16.msra.mxu0 %v785_v29 }
  0xa2   : > { %787 = vmatprep.subr.bf16.mxu0 %v1103_v0 }
  0xa5   : > { %789 = vmatpush3.bf16.msra.mxu0 %v788_v32 }
  0xa6   : > { %790 = vmatprep.subr.bf16.mxu0 %v1103_v0 }
  0xa9   : > { %792 = vmatpush3.bf16.msra.mxu0 %v791_v40 }
 0x161   : > { %v361_v34 = vpop.f32.mrb[0].mxu1 }
 0x162   : > { %v365_v35 = vadd.f32 %v361_v34, %v287_v33  ;;  %v713_v36 = vpop.f32.mrb[1].mxu1 }
 0x164   : > { %367 = vst.msk [vmem:[#allocation2] sm:$0xff] %vm285_vm1, %v365_v35 }
 0x16b   : > { %v371_v37 = vld [vmem:[#allocation2] sm:$0xff] }
 0x16c   : > { %723 = vmatmul.mubr.msk.f32.vlgmr.msra.gmra.mrb[2].mxu1 %vm285_vm1, %v371_v37 }
 0x23f   : > { %v445_v41 = vpop.f32.mrb[2].mxu1 }
 0x240   : > { %v449_v42 = vmax.f32 %v445_v41, 0.0  ;;  %v724_v43 = vpop.f32.mrb[3].mxu1 }
 0x242   : > { %758 = vmatmul.mubr.f32.vlgmr.msra.gmra.mrb[0].mxu0 %v449_v42 }
 0x315   : > { %v532_v44 = vpop.f32.mrb[0].mxu0 }
 0x316   : > { %536 = vst [vmem:[%s279_s23] sm:$0xff] %v532_v44  ;;  %v759_v45 = vpop.f32.mrb[1].mxu0 }
 0x317   : > { %1018 = shalt.err (!%p1015_p0)
}
 0x318   : > { %s1019_s12 = scalar_lea.hbm %s1376_s28, 128  ;;  %s1023_s6 = scalar_lea.hbm %s1427_s4, 256 }
 0x319   : > { %p1020_p4 = scmp.ne.s32.totalorder %s1376_s28, %s1019_s12  ;;  %p1024_p1 = scmp.lt.u32.totalorder %s1376_s28, %s1427_s4 }
 0x31a   : > { %p1025_p12 = scmp.lt.u32.totalorder %s1023_s6, %s1019_s12  ;;  %p1027_p13 = scmp.lt.u32.totalorder %s1019_s12, %s1376_s28 }
 0x31b   : > { %p1021_p2 = pnand %p1020_p4, %p1292_p10 }
 0x31c   : > { %p1026_p11 = por %p1025_p12, %p1024_p1 }
 0x31d   : > { %p1022_p8 = pneg %p1021_p2 }
 0x31e   : > { %p1028_p6 = por %p1027_p13, %p1026_p11 }
 0x320   : > { %p1029_p3 = pnand %p1028_p6, %p1022_p8 }
 0x322   : > { %1032 = shalt.err (!%p1029_p3)
}
 0x323   : > { %807 = dma.vmem_to_hbm [thread:$0]  (%p1292_p10), %s1371_s25, 128, %s1376_s28, %s538_s29  }
 0x324 PF: > { %s1447_s11 = sld [smem:[#allocation16_spill]]  ;;  %s563_s23 = sand.u32 1, %s1075_s15  }
 0x325   : > { %p1449_p7 = scmp.ge.s32.totalorder %s1095_s20, 2  ;;  %s564_s27 = scalar_lea.sflag [#allocation5], %s563_s23 }
 0x32a   : > { %p1448_p5 = scmp.ne.s32.totalorder %s1447_s11, 0 }
 0x32c   : > { %p824_p9 = pnand %p1449_p7, %p1448_p5 }
 0x32e   : > { %1070 = dma.done.wait (!%p824_p9), %s564_s27, 128  }
 0x32f   : > { %1072 = vsyncadd (!%p824_p9), %s564_s27, 4294967168  ;;  %s22_s20 = sadd.s32 1, %s1095_s20   ;;  %s1450_s15 = smov %s1079_s16 }
 0x330   : > { %p19_p0 = scmp.ge.s32.totalorder %s22_s20, 4   ;;  %s1451_s16 = smov %s1083_s17 }
 0x331   : > { %s1452_s17 = smov %s1304_s7  ;;  %s1453_s18 = smov %s1091_s19 }
 0x332   : > { %s1454_s19 = smov %s1456_s30  ;;  %21 = sbr.rel (!%p19_p0) target bundleno = 8 (0x8), region = 102 }
 0x339   :  { %569 = vsyncpa [#allocation4], 1 }
 0x33a   :  { %571 = vsyncpa [#allocation4 + $0x1], 1 }
 0x33b   :  { %572 = vsyncpa [#allocation7], 1 }
 0x33c   :  { %573 = vsyncpa [#allocation10], 1 }
 0x33d   :  { %574 = vsyncpa [#allocation5], 1 }
 0x33e   :  { %576 = vsyncpa [#allocation5 + $0x1], 1 }

</bundles_post_ra>
